<compile_context>
chip_gen: v6e
topology: v6e:2x2x1
jax: 0.10.0
libtpu: 0.0.40
codegen_flags: <defaults>
</compile_context>

<pallas_src>
import functools

import jax
import jax.numpy as jnp
from jax.experimental import pallas as pl
from jax.experimental.pallas import tpu as pltpu

ALPHA = 0.1   # args.alpha
MU = 0.9      # fixed in GNNsLF.__init__
NITER = 4     # args.K

_LANE = 128


def _round_up(x, m):
    return (x + m - 1) // m * m


def _vmem_limit_bytes(headroom=16 * 2**20, floor=32 * 2**20):
    """Per-generation scoped-VMEM budget: physical capacity minus headroom."""
    try:
        cap = pltpu.get_tpu_info().vmem_capacity_bytes
    except Exception:
        cap = 64 * 2**20  # conservative fallback (v7x per-TC physical VMEM)
    return max(cap - headroom, floor)


def gnnlf_kernel(xt_ref, w1_ref, b1_ref, w2_ref, b2_ref, a_ref, ot_ref,
                 *, alpha, mu, niter):
    # Everything transposed: [feature/class, node] — nodes on the lane axis.
    xt = xt_ref[...]                                  # [F, NP] f32
    a = a_ref[...]                                    # [NP, NP] bf16/f32, symmetric
    prop_dtype = a.dtype

    # lin1 + ReLU (transposed): h_t = relu(W1 @ x_t + b1)
    ht = jnp.dot(w1_ref[...], xt, preferred_element_type=jnp.float32)
    ht = jnp.maximum(ht + b1_ref[...], 0.0)           # [H, NP]

    # lin2 (transposed): z_t = W2 @ h_t + b2
    zt = jnp.dot(w2_ref[...], ht, preferred_element_type=jnp.float32)
    zt = zt + b2_ref[...]                             # [C, NP] f32

    # LF power iteration, transposed.  A_hat symmetric => (A @ z)^T = z^T @ A,
    # so every propagation matmul has free/lane dim = NP (lane-dense), with
    # bf16 operands and f32 accumulation on the MXU.
    c0 = mu / (1.0 + alpha * mu - alpha)
    c1 = 1.0 - 2.0 * alpha + mu * alpha
    az = jnp.dot(zt.astype(prop_dtype), a, preferred_element_type=jnp.float32)
    preds = c0 * zt + (1.0 - mu) * az
    for _ in range(niter):                            # niter static -> unrolled
        preds = c1 * jnp.dot(preds.astype(prop_dtype), a,
                             preferred_element_type=jnp.float32) + zt

    # log_softmax over the class dim = sublane axis 0 of [C, NP].
    m = jnp.max(preds, axis=0, keepdims=True)         # [1, NP]
    s = preds - m
    lse = jnp.log(jnp.sum(jnp.exp(s), axis=0, keepdims=True))
    ot_ref[...] = s - lse                             # [C, NP] lane-dense store


def gnnlf_forward(x, w1, b1, w2, b2, a_hat, *, alpha=ALPHA, mu=MU, niter=NITER,
                  a_dtype=jnp.bfloat16):
    """x: [N, F]; w1: [H, F]; b1: [H]; w2: [C, H]; b2: [C];
    a_hat: [N, N], MUST be symmetric (undirected normalized adjacency)."""
    n, f = x.shape
    hdim = w1.shape[0]
    c = w2.shape[0]

    # Pad the node (lane) dim up to a multiple of 128; zero padding keeps the
    # real node columns numerically identical (zero rows/cols in A_hat).
    n_pad = _round_up(n, _LANE)
    pad = n_pad - n
    xt = jnp.pad(x.astype(jnp.float32).T, ((0, 0), (0, pad)))            # [F, NP]
    a_p = jnp.pad(a_hat.astype(jnp.float32),
                  ((0, pad), (0, pad))).astype(a_dtype)                  # [NP, NP]

    a_bytes = n_pad * n_pad * jnp.dtype(a_dtype).itemsize
    cost = pl.CostEstimate(
        flops=2 * (hdim * f * n_pad + c * hdim * n_pad
                   + (niter + 1) * c * n_pad * n_pad),
        transcendentals=(c + 1) * n_pad,               # exp per [C,NP] + log per [1,NP]
        bytes_accessed=(a_bytes + f * n_pad * 4
                        + (hdim * f + hdim + c * hdim + c) * 4
                        + c * n_pad * 4),
    )

    kernel = functools.partial(gnnlf_kernel, alpha=alpha, mu=mu, niter=niter)
    vmem = pl.BlockSpec(memory_space=pltpu.MemorySpace.VMEM)
    out_t = pl.pallas_call(
        kernel,
        out_shape=jax.ShapeDtypeStruct((c, n_pad), jnp.float32),
        in_specs=[vmem] * 6,
        out_specs=vmem,
        compiler_params=pltpu.CompilerParams(
            vmem_limit_bytes=_vmem_limit_bytes(),
        ),
        cost_estimate=cost,
    )(xt,
      w1.astype(jnp.float32),
      b1.astype(jnp.float32).reshape(hdim, 1),
      w2.astype(jnp.float32),
      b2.astype(jnp.float32).reshape(c, 1),
      a_p)
    # Layout plumbing only: drop padded node columns, back to [N, C].
    return out_t[:, :n].T


def _reference(x, w1, b1, w2, b2, a_hat, alpha=ALPHA, mu=MU, niter=NITER):
    h = jnp.maximum(x @ w1.T + b1, 0.0)
    z = h @ w2.T + b2
    preds = mu / (1 + alpha * mu - alpha) * z + (1 - mu) * (a_hat @ z)
    for _ in range(niter):
        preds = (1 - 2 * alpha + mu * alpha) * (a_hat @ preds) + z
    return jax.nn.log_softmax(preds, axis=1)


if __name__ == "__main__":
    key = jax.random.PRNGKey(0)
    N, F, H, C = 64, 32, 32, 8  # nodes, num_features, args.hidden, num_classes
    k1, k2, k3, k4, k5, k6, k7 = jax.random.split(key, 7)

    # node features
    x = jax.random.normal(k1, (N, F), jnp.float32)

    # nn.Linear default init (uniform +- 1/sqrt(fan_in)); stored PyTorch-style
    # as [out, in] — the transposed kernel consumes this layout directly.
    lim1 = 1.0 / (F ** 0.5)
    w1 = jax.random.uniform(k2, (H, F), jnp.float32, -lim1, lim1)
    b1 = jax.random.uniform(k3, (H,), jnp.float32, -lim1, lim1)
    lim2 = 1.0 / (H ** 0.5)
    w2 = jax.random.uniform(k4, (C, H), jnp.float32, -lim2, lim2)
    b2 = jax.random.uniform(k5, (C,), jnp.float32, -lim2, lim2)

    # synthetic edge_index -> dense adjacency -> A_hat = D^-1/2 (A + I) D^-1/2
    num_edges = 256
    src = jax.random.randint(k6, (num_edges,), 0, N)
    dst = jax.random.randint(k7, (num_edges,), 0, N)
    adj = jnp.zeros((N, N), jnp.float32).at[src, dst].set(1.0)
    adj = jnp.maximum(adj, adj.T)                 # symmetrize (contract: A_hat symmetric)
    A = adj + jnp.eye(N, dtype=jnp.float32)       # A + I  (as in _calc_A_hat)
    d_invsqrt = 1.0 / jnp.sqrt(jnp.sum(A, axis=1))
    a_hat = d_invsqrt[:, None] * A * d_invsqrt[None, :]   # symmetric by construction

    ref = _reference(x, w1, b1, w2, b2, a_hat)

    # Default (performance) path: bf16 A_hat / propagation operands, f32 accum.
    out_bf16 = gnnlf_forward(x, w1, b1, w2, b2, a_hat)
    jax.block_until_ready(out_bf16)
    assert out_bf16.shape == (N, C)
    assert jnp.allclose(out_bf16, ref, atol=5e-2, rtol=5e-2), (
        "bf16 propagation path out of tolerance")

    # f32 path: tight tolerance (same math as v2, now with lane padding).
    out_f32 = gnnlf_forward(x, w1, b1, w2, b2, a_hat, a_dtype=jnp.float32)
    jax.block_until_ready(out_f32)
    assert jnp.allclose(out_f32, ref, atol=1e-4, rtol=1e-4), (
        "f32 path out of tolerance")

    print("KERNEL_OK")
</pallas_src>

<mosaic_0001>
module attributes {stable_mosaic.version = 11 : i64} {
  func.func @gnnlf_kernel(%arg0: memref<32x128xf32, #tpu.memory_space<vmem>>, %arg1: memref<32x32xf32, #tpu.memory_space<vmem>>, %arg2: memref<32x1xf32, #tpu.memory_space<vmem>>, %arg3: memref<8x32xf32, #tpu.memory_space<vmem>>, %arg4: memref<8x1xf32, #tpu.memory_space<vmem>>, %arg5: memref<128x128xbf16, #tpu.memory_space<vmem>>, %arg6: memref<8x128xf32, #tpu.memory_space<vmem>>) attributes {dimension_semantics = [], scalar_prefetch = 0 : i64, scratch_operands = 0 : i64, tpu.core_type = #tpu.core_type<tc>} {
    %c0 = arith.constant 0 : index
    %c0_0 = arith.constant 0 : index
    %0 = vector.load %arg0[%c0, %c0_0] : memref<32x128xf32, #tpu.memory_space<vmem>>, vector<32x128xf32>
    %c0_1 = arith.constant 0 : index
    %c0_2 = arith.constant 0 : index
    %1 = vector.load %arg5[%c0_1, %c0_2] : memref<128x128xbf16, #tpu.memory_space<vmem>>, vector<128x128xbf16>
    %c0_3 = arith.constant 0 : index
    %c0_4 = arith.constant 0 : index
    %2 = vector.load %arg1[%c0_3, %c0_4] : memref<32x32xf32, #tpu.memory_space<vmem>>, vector<32x32xf32>
    %cst = arith.constant dense<0.000000e+00> : vector<32x128xf32>
    %3 = tpu.matmul %2, %0, %cst {dimension_numbers = #tpu.dot_dimension_numbers<[1], [0], [0], [1], [0, 0, 1, 1], [], []>} : vector<32x32xf32>, vector<32x128xf32>, vector<32x128xf32> -> vector<32x128xf32>
    %c0_5 = arith.constant 0 : index
    %c0_6 = arith.constant 0 : index
    %4 = vector.load %arg2[%c0_5, %c0_6] : memref<32x1xf32, #tpu.memory_space<vmem>>, vector<32x1xf32>
    %5 = vector.broadcast %4 : vector<32x1xf32> to vector<32x128xf32>
    %6 = arith.addf %3, %5 : vector<32x128xf32>
    %cst_7 = arith.constant 0.000000e+00 : f32
    %7 = vector.broadcast %cst_7 : f32 to vector<32x128xf32>
    %8 = arith.maximumf %6, %7 : vector<32x128xf32>
    %c0_8 = arith.constant 0 : index
    %c0_9 = arith.constant 0 : index
    %9 = vector.load %arg3[%c0_8, %c0_9] : memref<8x32xf32, #tpu.memory_space<vmem>>, vector<8x32xf32>
    %cst_10 = arith.constant dense<0.000000e+00> : vector<8x128xf32>
    %10 = tpu.matmul %9, %8, %cst_10 {dimension_numbers = #tpu.dot_dimension_numbers<[1], [0], [0], [1], [0, 0, 1, 1], [], []>} : vector<8x32xf32>, vector<32x128xf32>, vector<8x128xf32> -> vector<8x128xf32>
    %c0_11 = arith.constant 0 : index
    %c0_12 = arith.constant 0 : index
    %11 = vector.load %arg4[%c0_11, %c0_12] : memref<8x1xf32, #tpu.memory_space<vmem>>, vector<8x1xf32>
    %12 = vector.broadcast %11 : vector<8x1xf32> to vector<8x128xf32>
    %13 = arith.addf %10, %12 : vector<8x128xf32>
    %14 = arith.truncf %13 : vector<8x128xf32> to vector<8x128xbf16>
    %cst_13 = arith.constant dense<0.000000e+00> : vector<8x128xf32>
    %15 = tpu.matmul %14, %1, %cst_13 {dimension_numbers = #tpu.dot_dimension_numbers<[1], [0], [0], [1], [0, 0, 1, 1], [], []>} : vector<8x128xbf16>, vector<128x128xbf16>, vector<8x128xf32> -> vector<8x128xf32>
    %cst_14 = arith.constant 0.909090936 : f32
    %16 = vector.broadcast %cst_14 : f32 to vector<8x128xf32>
    %17 = arith.mulf %16, %13 : vector<8x128xf32>
    %cst_15 = arith.constant 1.000000e-01 : f32
    %18 = vector.broadcast %cst_15 : f32 to vector<8x128xf32>
    %19 = arith.mulf %18, %15 : vector<8x128xf32>
    %20 = arith.addf %17, %19 : vector<8x128xf32>
    %21 = arith.truncf %20 : vector<8x128xf32> to vector<8x128xbf16>
    %cst_16 = arith.constant dense<0.000000e+00> : vector<8x128xf32>
    %22 = tpu.matmul %21, %1, %cst_16 {dimension_numbers = #tpu.dot_dimension_numbers<[1], [0], [0], [1], [0, 0, 1, 1], [], []>} : vector<8x128xbf16>, vector<128x128xbf16>, vector<8x128xf32> -> vector<8x128xf32>
    %cst_17 = arith.constant 0.889999985 : f32
    %23 = vector.broadcast %cst_17 : f32 to vector<8x128xf32>
    %24 = arith.mulf %23, %22 : vector<8x128xf32>
    %25 = arith.addf %24, %13 : vector<8x128xf32>
    %26 = arith.truncf %25 : vector<8x128xf32> to vector<8x128xbf16>
    %cst_18 = arith.constant dense<0.000000e+00> : vector<8x128xf32>
    %27 = tpu.matmul %26, %1, %cst_18 {dimension_numbers = #tpu.dot_dimension_numbers<[1], [0], [0], [1], [0, 0, 1, 1], [], []>} : vector<8x128xbf16>, vector<128x128xbf16>, vector<8x128xf32> -> vector<8x128xf32>
    %cst_19 = arith.constant 0.889999985 : f32
    %28 = vector.broadcast %cst_19 : f32 to vector<8x128xf32>
    %29 = arith.mulf %28, %27 : vector<8x128xf32>
    %30 = arith.addf %29, %13 : vector<8x128xf32>
    %31 = arith.truncf %30 : vector<8x128xf32> to vector<8x128xbf16>
    %cst_20 = arith.constant dense<0.000000e+00> : vector<8x128xf32>
    %32 = tpu.matmul %31, %1, %cst_20 {dimension_numbers = #tpu.dot_dimension_numbers<[1], [0], [0], [1], [0, 0, 1, 1], [], []>} : vector<8x128xbf16>, vector<128x128xbf16>, vector<8x128xf32> -> vector<8x128xf32>
    %cst_21 = arith.constant 0.889999985 : f32
    %33 = vector.broadcast %cst_21 : f32 to vector<8x128xf32>
    %34 = arith.mulf %33, %32 : vector<8x128xf32>
    %35 = arith.addf %34, %13 : vector<8x128xf32>
    %36 = arith.truncf %35 : vector<8x128xf32> to vector<8x128xbf16>
    %cst_22 = arith.constant dense<0.000000e+00> : vector<8x128xf32>
    %37 = tpu.matmul %36, %1, %cst_22 {dimension_numbers = #tpu.dot_dimension_numbers<[1], [0], [0], [1], [0, 0, 1, 1], [], []>} : vector<8x128xbf16>, vector<128x128xbf16>, vector<8x128xf32> -> vector<8x128xf32>
    %cst_23 = arith.constant 0.889999985 : f32
    %38 = vector.broadcast %cst_23 : f32 to vector<8x128xf32>
    %39 = arith.mulf %38, %37 : vector<8x128xf32>
    %40 = arith.addf %39, %13 : vector<8x128xf32>
    %cst_24 = arith.constant dense<0xFF800000> : vector<128xf32>
    %41 = vector.multi_reduction <maximumf>, %40, %cst_24 [0] : vector<8x128xf32> to vector<128xf32>
    %42 = vector.shape_cast %41 : vector<128xf32> to vector<1x128xf32>
    %43 = vector.broadcast %42 : vector<1x128xf32> to vector<8x128xf32>
    %44 = arith.subf %40, %43 : vector<8x128xf32>
    %45 = math.exp %44 : vector<8x128xf32>
    %cst_25 = arith.constant dense<0.000000e+00> : vector<128xf32>
    %46 = vector.multi_reduction <add>, %45, %cst_25 [0] : vector<8x128xf32> to vector<128xf32>
    %47 = vector.shape_cast %46 : vector<128xf32> to vector<1x128xf32>
    %48 = math.log %47 : vector<1x128xf32>
    %49 = vector.broadcast %48 : vector<1x128xf32> to vector<8x128xf32>
    %50 = arith.subf %44, %49 : vector<8x128xf32>
    %c0_26 = arith.constant 0 : index
    %c0_27 = arith.constant 0 : index
    %51 = vector.load %arg6[%c0_26, %c0_27] : memref<8x128xf32, #tpu.memory_space<vmem>>, vector<8x128xf32>
    tpu.vector_store %arg6[%c0_26, %c0_27], %50 {strides = array<i32>} : memref<8x128xf32, #tpu.memory_space<vmem>>, vector<8x128xf32>,
    return
  }
}

</mosaic_0001>

<bundles_post_ra>
// kernel: tpu_custom_call.1
= control target key start
LH: loop header
LB: loop body
LE: loop exit
PB: predicated region body
PF: predicated region fallthrough
CT: control target
= control target key end

     0   :  { %11 = vsyncpa [#allocation3], 0  ;;  %s1078_s0 = inlined_call_operand.vmem [shape: f32[32,128], index: 0, kind: input, shape index: {}]   ;;  %s1079_s1 = inlined_call_operand.hbm [shape: f32[32,32], index: 1, kind: input, shape index: {}]   ;;  %s1080_s2 = inlined_call_operand.vmem [shape: f32[32,1], index: 2, kind: input, shape index: {}]   ;;  %s1081_s3 = inlined_call_operand.vmem [shape: f32[8,32], index: 3, kind: input, shape index: {}]   ;;  %s1082_s4 = inlined_call_operand.vmem [shape: f32[8,1], index: 4, kind: input, shape index: {}]   ;;  %s1083_s5 = inlined_call_operand.hbm [shape: bf16[128,128], index: 5, kind: input, shape index: {}]   ;;  %s1084_s6 = inlined_call_operand.hbm [shape: f32[8,128], index: 6, kind: output, shape index: {}]  }
   0x1   :  { %12 = vsyncpa [#allocation6], 0 }
   0x2   :  { %13 = vsyncpa [#allocation4], 0  ;;  %s868_s21 = smov [#allocation2]  }
   0x3   :  { %s21_s22 = sshll.u32 %s868_s21, 4  ;;  %s22_s22 = int_to_ptr.vmem [resolvable:$true] %s21_s22 }
   0x4   :  { %s810_s23 = scalar_lea.vmem %s22_s22, 512  ;;  %p815_p1 = scmp.lt.s32.totalorder %s22_s22, %s22_s22 }
   0x5   :  { %p811_p0 = scmp.ne.s32.totalorder %s22_s22, %s810_s23  ;;  %p816_p2 = scmp.lt.s32.totalorder %s810_s23, %s810_s23 }
   0x7   :  { %p817_p3 = por %p816_p2, %p815_p1 }
   0x9   :  { %p818_p4 = pnand %p817_p3, %p811_p0 }
   0xb   :  { %821 = shalt.err (!%p818_p4)
}
   0xc   :  { %s869_s24 = smov 128   ;;  %s870_s25 = smov 8  }
   0xd   :  { %27 = dma.hbm_to_vmem [thread:$0]  %s1079_s1, 512, %s22_s22, [#allocation3], %s869_s24, %s869_s24, %s870_s25  }
   0xe   :  { %s871_s28 = smov [#allocation5]  }
   0xf   :  { %s39_s29 = sshll.u32 %s871_s28, 4  ;;  %s40_s29 = int_to_ptr.vmem [resolvable:$true] %s39_s29 }
  0x10   :  { %s830_s30 = scalar_lea.vmem %s40_s29, 1024  ;;  %p835_p6 = scmp.lt.s32.totalorder %s40_s29, %s40_s29 }
  0x11   :  { %p831_p5 = scmp.ne.s32.totalorder %s40_s29, %s830_s30  ;;  %p836_p7 = scmp.lt.s32.totalorder %s830_s30, %s830_s30 }
  0x13   :  { %p837_p8 = por %p836_p7, %p835_p6 }
  0x15   :  { %p838_p9 = pnand %p837_p8, %p831_p5 }
  0x17   :  { %841 = shalt.err (!%p838_p9)
}
  0x18   :  { %s872_s7 = smov 64   ;;  %s873_s8 = smov 4  }
  0x19   :  { %45 = dma.hbm_to_vmem [thread:$0]  %s1083_s5, 1024, %s40_s29, [#allocation6], %s872_s7, %s872_s7, %s873_s8  }
  0x1a   :  { %862 = dma.done.wait [#allocation3], 512  }
  0x1b   :  { %863 = vsyncadd [#allocation3], 4294966784 }
  0x1c   :  { %864 = dma.done.wait [#allocation6], 1024  }
  0x1d   :  { %865 = vsyncadd [#allocation6], 4294966272  ;;  %v874_v0 = vmov 0   ;;  %vm101_vm0 = vcmask 261120   ;;  %v56_v1 = vld [vmem:[%s1078_s0 + $0x18] sm:$0xff]  ;;  %v55_v2 = vld [vmem:[%s1078_s0 + $0x10] sm:$0xff] }
  0x1e   :  { %788 = vset.pattern.permute.xlu0 %v874_v0  ;;  %789 = vset.pattern.permute.xlu1 %v874_v0  ;;  %v73_v3 = vld [vmem:[#allocation2] sm:$0xff]  ;;  %v54_v4 = vld [vmem:[%s1078_s0 + $0x8] sm:$0xff]  ;;  %v80_v5 = vld [vmem:[%s1080_s2 + $0x18] sm:$0xff]  ;;  %v875_v14 = vmov 0.0   ;;  %vm876_vm1 = vmmov 0  }
  0x1f   :  { %653 = vmatprep.subr.mxu1 %v56_v1  ;;  %661 = vmatprep.mubr.msk.f32.mxu1 %vm101_vm0, %v73_v3  ;;  %v53_v6 = vld [vmem:[%s1078_s0] sm:$0xff]  ;;  %v79_v7 = vld [vmem:[%s1080_s2 + $0x10] sm:$0xff]  ;;  %v78_v8 = vld [vmem:[%s1080_s2 + $0x8] sm:$0xff] }
  0x20   :  { %654 = vmatpush3.msra.mxu1 %v56_v1  ;;  %98 = vperm.xlu0 %788, %v80_v5   ;;  %v74_v9 = vld [vmem:[#allocation2 + $0x8] sm:$0xff]  ;;  %v77_v10 = vld [vmem:[%s1080_s2] sm:$0xff]  ;;  %v75_v11 = vld [vmem:[#allocation2 + $0x10] sm:$0xff] }
  0x21   :  { %655 = vmatprep.subr.mxu1 %v55_v2  ;;  %88 = vperm.xlu1 %789, %v78_v8   ;;  %v204_v12 = vld [vmem:[%s1082_s4] sm:$0xff]  ;;  %v76_v13 = vld [vmem:[#allocation2 + $0x18] sm:$0xff]  ;;  %v959_v16 = vld [vmem:[#allocation5 + $0x30] sm:$0xff]  }
  0x22   :  { %656 = vmatpush3.msra.mxu1 %v55_v2  ;;  %678 = vmatprep.subr.bf16.mxu0 %v875_v14  ;;  %v956_v15 = vld [vmem:[#allocation5 + $0x38] sm:$0xff]   ;;  %v963_v17 = vld [vmem:[#allocation5 + $0x28] sm:$0xff]   ;;  %v967_v18 = vld [vmem:[#allocation5 + $0x20] sm:$0xff]  }
  0x23   :  { %657 = vmatprep.subr.mxu1 %v54_v4  ;;  %694 = vmatprep.mubr.msk.bf16.mxu0 %vm876_vm1, %v875_v14  ;;  %v971_v19 = vld [vmem:[#allocation5 + $0x18] sm:$0xff]   ;;  %v975_v20 = vld [vmem:[#allocation5 + $0x10] sm:$0xff]   ;;  %v979_v21 = vld [vmem:[#allocation5 + $0x8] sm:$0xff]  }
  0x24   :  { %658 = vmatpush3.msra.mxu1 %v54_v4  ;;  %93 = vperm.xlu0 %788, %v79_v7   ;;  %v203_v38 = vld [vmem:[%s1081_s3] sm:$0xff]  ;;  %s877_s3 = smov [#allocation7]  }
  0x25   :  { %659 = vmatprep.subr.mxu1 %v53_v6  ;;  %83 = vperm.xlu1 %789, %v77_v10   ;;  %v1008_v39 = vld [vmem:[#allocation5] sm:$0xff]   ;;  %s572_s26 = sshll.u32 %s877_s3, 4  ;;  %s573_s26 = int_to_ptr.vmem [resolvable:$true] %s572_s26 }
  0x26   :  { %660 = vmatpush3.msra.mxu1 %v53_v6  ;;  %679 = vmatpush3.bf16.msra.mxu0 %v956_v15  ;;  %s842_s27 = scalar_lea.vmem %s573_s26, 128  ;;  %p847_p11 = scmp.lt.s32.totalorder %s573_s26, %s573_s26 }
  0x27   :  { %662 = vmatmul.mubr.msk.f32.vlgmr.msra.gmra.mxu1 %vm101_vm0, %v74_v9  ;;  %667 = vmatprep.subr.mxu1 %v875_v14  ;;  %p843_p10 = scmp.ne.s32.totalorder %s573_s26, %s842_s27  ;;  %p848_p12 = scmp.lt.s32.totalorder %s842_s27, %s842_s27 }
  0x28   :  { %664 = vmatprep.mubr.msk.f32.mxu1 %vm101_vm0, %v75_v11  ;;  %207 = vperm.xlu0 %788, %v204_v12  }
  0x29   :  { %680 = vmatprep.subr.bf16.mxu0 %v875_v14  ;;  %p849_p13 = por %p848_p12, %p847_p11 }
  0x2a   :  { %681 = vmatpush3.bf16.msra.mxu0 %v959_v16 }
  0x2b   :  { %665 = vmatmul.mubr.msk.f32.gmra.mxu1 %vm101_vm0, %v76_v13  ;;  %682 = vmatprep.subr.bf16.mxu0 %v875_v14  ;;  %p850_p0 = pnand %p849_p13, %p843_p10 }
  0x2c   :  { %675 = vmatprep.mubr.msk.f32.mxu1 %vm876_vm1, %v875_v14 }
  0x2e   :  { %683 = vmatpush3.bf16.msra.mxu0 %v963_v17 }
  0x2f   :  { %684 = vmatprep.subr.bf16.mxu0 %v875_v14 }
  0x32   :  { %685 = vmatpush3.bf16.msra.mxu0 %v967_v18 }
  0x33   :  { %686 = vmatprep.subr.bf16.mxu0 %v875_v14 }
  0x36   :  { %687 = vmatpush3.bf16.msra.mxu0 %v971_v19 }
  0x37   :  { %688 = vmatprep.subr.bf16.mxu0 %v875_v14 }
  0x3a   :  { %689 = vmatpush3.bf16.msra.mxu0 %v975_v20 }
  0x3b   :  { %690 = vmatprep.subr.bf16.mxu0 %v875_v14 }
  0x3e   :  { %691 = vmatpush3.bf16.msra.mxu0 %v979_v21 }
  0x3f   :  { %692 = vmatprep.subr.bf16.mxu0 %v875_v14 }
  0x42   :  { %693 = vmatpush3.bf16.msra.mxu0 %v1008_v39 }
  0x43   :  { %718 = vmatprep.subr.bf16.mxu0 %v875_v14 }
  0x9b   :  { %v99_v22 = vpop.permute.xlu0 %98 }
  0x9c   :  { %v89_v23 = vpop.permute.xlu1 %88 }
  0x9f   :  { %v94_v27 = vpop.permute.xlu0 %93 }
  0xa0   :  { %v84_v29 = vpop.permute.xlu1 %83 }
  0xa3   :  { %v208_v40 = vpop.permute.xlu0 %207 }
  0xe7   :  { %v663_v24 = vpop.f32.mrf.mxu1 }
  0xe8   :  { %v186_v31 = vadd.f32 %v663_v24, %v89_v23 }
  0xe9   :  { %v180_v25 = vpop.f32.mrf.mxu1 }
  0xea   :  { %v181_v34 = vadd.f32 %v180_v25, %v84_v29  ;;  %v200_v36 = vmax.f32 %v186_v31, 0.0 }
  0xeb   :  { %v666_v26 = vpop.f32.mrf.mxu1 }
  0xec   :  { %v196_v28 = vadd.f32 %v666_v26, %v99_v22  ;;  %v199_v37 = vmax.f32 %v181_v34, 0.0 }
  0xed   :  { %v190_v30 = vpop.f32.mrf.mxu1 }
  0xee   :  { %v202_v32 = vmax.f32 %v196_v28, 0.0  ;;  %v191_v33 = vadd.f32 %v190_v30, %v94_v27 }
  0xf0   :  { %v201_v35 = vmax.f32 %v191_v33, 0.0  ;;  %668 = vmatpush3.msra.mxu1 %v202_v32 }
  0xf1   :  { %669 = vmatprep.subr.mxu1 %v875_v14 }
  0xf2   :  { %670 = vmatpush3.msra.mxu1 %v201_v35 }
  0xf3   :  { %671 = vmatprep.subr.mxu1 %v875_v14 }
  0xf4   :  { %672 = vmatpush3.msra.mxu1 %v200_v36 }
  0xf5   :  { %673 = vmatprep.subr.mxu1 %v875_v14 }
  0xf6   :  { %674 = vmatpush3.msra.mxu1 %v199_v37 }
  0xf7   :  { %676 = vmatmul.mubr.msk.f32.vlgmr.msra.gmra.mxu1 %vm101_vm0, %v203_v38  ;;  %698 = vmatprep.subr.bf16.mxu1 %v875_v14 }
  0xf8   :  { %699 = vmatpush3.bf16.msra.mxu1 %v956_v15  ;;  %714 = vmatprep.mubr.msk.bf16.mxu1 %vm876_vm1, %v875_v14 }
  0xf9   :  { %700 = vmatprep.subr.bf16.mxu1 %v875_v14 }
  0xfc   :  { %701 = vmatpush3.bf16.msra.mxu1 %v959_v16 }
  0xfd   :  { %702 = vmatprep.subr.bf16.mxu1 %v875_v14 }
 0x100   :  { %703 = vmatpush3.bf16.msra.mxu1 %v963_v17 }
 0x101   :  { %704 = vmatprep.subr.bf16.mxu1 %v875_v14 }
 0x104   :  { %705 = vmatpush3.bf16.msra.mxu1 %v967_v18 }
 0x105   :  { %706 = vmatprep.subr.bf16.mxu1 %v875_v14 }
 0x108   :  { %707 = vmatpush3.bf16.msra.mxu1 %v971_v19 }
 0x109   :  { %708 = vmatprep.subr.bf16.mxu1 %v875_v14 }
 0x10c   :  { %709 = vmatpush3.bf16.msra.mxu1 %v975_v20 }
 0x10d   :  { %710 = vmatprep.subr.bf16.mxu1 %v875_v14 }
 0x110   :  { %711 = vmatpush3.bf16.msra.mxu1 %v979_v21 }
 0x111   :  { %712 = vmatprep.subr.bf16.mxu1 %v875_v14 }
 0x114   :  { %713 = vmatpush3.bf16.msra.mxu1 %v1008_v39 }
 0x115   :  { %738 = vmatprep.subr.bf16.mxu1 %v875_v14 }
 0x1b7   :  { %v279_v41 = vpop.f32.mrf.mxu1 }
 0x1b8   :  { %v1014_v42 = vadd.f32 %v279_v41, %v208_v40 }
 0x1b9   :  { %v677_v43 = vpop.f32.mrf.mxu1 }
 0x1ba   :  { %v283_v44 = vpack.c.bf16 %v1014_v42, %v1014_v42  ;;  %v372_v46 = vmul.f32 0.90909094, %v1014_v42 }
 0x1bc   :  { %695 = vmatmul.mubr.bf16.vlgmr.msra.gmra.mxu0 %v283_v44 }
 0x1bd   :  { %719 = vmatpush3.bf16.msra.mxu0 %v956_v15  ;;  %734 = vmatprep.mubr.msk.bf16.mxu0 %vm876_vm1, %v875_v14 }
 0x1be   :  { %720 = vmatprep.subr.bf16.mxu0 %v875_v14 }
 0x1c1   :  { %721 = vmatpush3.bf16.msra.mxu0 %v959_v16 }
 0x1c2   :  { %722 = vmatprep.subr.bf16.mxu0 %v875_v14 }
 0x1c5   :  { %723 = vmatpush3.bf16.msra.mxu0 %v963_v17 }
 0x1c6   :  { %724 = vmatprep.subr.bf16.mxu0 %v875_v14 }
 0x1c9   :  { %725 = vmatpush3.bf16.msra.mxu0 %v967_v18 }
 0x1ca   :  { %726 = vmatprep.subr.bf16.mxu0 %v875_v14 }
 0x1cd   :  { %727 = vmatpush3.bf16.msra.mxu0 %v971_v19 }
 0x1ce   :  { %728 = vmatprep.subr.bf16.mxu0 %v875_v14 }
 0x1d1   :  { %729 = vmatpush3.bf16.msra.mxu0 %v975_v20 }
 0x1d2   :  { %730 = vmatprep.subr.bf16.mxu0 %v875_v14 }
 0x1d5   :  { %731 = vmatpush3.bf16.msra.mxu0 %v979_v21 }
 0x1d6   :  { %732 = vmatprep.subr.bf16.mxu0 %v875_v14 }
 0x1d9   :  { %733 = vmatpush3.bf16.msra.mxu0 %v1008_v39 }
 0x1da   :  { %758 = vmatprep.subr.bf16.mxu0 %v875_v14 }
 0x27c   :  { %v366_v45 = vpop.f32.mrf.mxu0 }
 0x27d   :  { %v373_v47 = vmul.f32 0.1, %v366_v45 }
 0x27e   :  { %v696_v48 = vpop.f32.mrf.mxu0 }
 0x27f   :  { %v374_v49 = vadd.f32 %v373_v47, %v372_v46 }
 0x280   :  { %v369_v50 = vpop.f32.mrf.mxu0 }
 0x281   :  { %v375_v51 = vpack.c.bf16 %v374_v49, %v374_v49 }
 0x282   :  { %v697_v52 = vpop.f32.mrf.mxu0 }
 0x283   :  { %715 = vmatmul.mubr.bf16.vlgmr.msra.gmra.mxu1 %v375_v51 }
 0x284   :  { %739 = vmatpush3.bf16.msra.mxu1 %v956_v15  ;;  %754 = vmatprep.mubr.msk.bf16.mxu1 %vm876_vm1, %v875_v14 }
 0x285   :  { %740 = vmatprep.subr.bf16.mxu1 %v875_v14 }
 0x288   :  { %741 = vmatpush3.bf16.msra.mxu1 %v959_v16 }
 0x289   :  { %742 = vmatprep.subr.bf16.mxu1 %v875_v14 }
 0x28c   :  { %743 = vmatpush3.bf16.msra.mxu1 %v963_v17 }
 0x28d   :  { %744 = vmatprep.subr.bf16.mxu1 %v875_v14 }
 0x290   :  { %745 = vmatpush3.bf16.msra.mxu1 %v967_v18 }
 0x291   :  { %746 = vmatprep.subr.bf16.mxu1 %v875_v14 }
 0x294   :  { %747 = vmatpush3.bf16.msra.mxu1 %v971_v19 }
 0x295   :  { %748 = vmatprep.subr.bf16.mxu1 %v875_v14 }
 0x298   :  { %749 = vmatpush3.bf16.msra.mxu1 %v975_v20 }
 0x299   :  { %750 = vmatprep.subr.bf16.mxu1 %v875_v14 }
 0x29c   :  { %751 = vmatpush3.bf16.msra.mxu1 %v979_v21 }
 0x29d   :  { %752 = vmatprep.subr.bf16.mxu1 %v875_v14 }
 0x2a0   :  { %753 = vmatpush3.bf16.msra.mxu1 %v1008_v39 }
 0x343   :  { %v410_v53 = vpop.f32.mrf.mxu1 }
 0x344   :  { %v416_v54 = vmul.f32 0.89, %v410_v53 }
 0x345   :  { %v716_v55 = vpop.f32.mrf.mxu1 }
 0x346   :  { %v417_v56 = vadd.f32 %v416_v54, %v1014_v42 }
 0x347   :  { %v413_v57 = vpop.f32.mrf.mxu1 }
 0x348   :  { %v418_v58 = vpack.c.bf16 %v417_v56, %v417_v56 }
 0x349   :  { %v717_v59 = vpop.f32.mrf.mxu1 }
 0x34a   :  { %735 = vmatmul.mubr.bf16.vlgmr.msra.gmra.mxu0 %v418_v58 }
 0x34b   :  { %759 = vmatpush3.bf16.msra.mxu0 %v956_v15  ;;  %774 = vmatprep.mubr.msk.bf16.mxu0 %vm876_vm1, %v875_v14 }
 0x34c   :  { %760 = vmatprep.subr.bf16.mxu0 %v875_v14 }
 0x34f   :  { %761 = vmatpush3.bf16.msra.mxu0 %v959_v16 }
 0x350   :  { %762 = vmatprep.subr.bf16.mxu0 %v875_v14 }
 0x353   :  { %763 = vmatpush3.bf16.msra.mxu0 %v963_v17 }
 0x354   :  { %764 = vmatprep.subr.bf16.mxu0 %v875_v14 }
 0x357   :  { %765 = vmatpush3.bf16.msra.mxu0 %v967_v18 }
 0x358   :  { %766 = vmatprep.subr.bf16.mxu0 %v875_v14 }
 0x35b   :  { %767 = vmatpush3.bf16.msra.mxu0 %v971_v19 }
 0x35c   :  { %768 = vmatprep.subr.bf16.mxu0 %v875_v14 }
 0x35f   :  { %769 = vmatpush3.bf16.msra.mxu0 %v975_v20 }
 0x360   :  { %770 = vmatprep.subr.bf16.mxu0 %v875_v14 }
 0x363   :  { %771 = vmatpush3.bf16.msra.mxu0 %v979_v21 }
 0x364   :  { %772 = vmatprep.subr.bf16.mxu0 %v875_v14 }
 0x367   :  { %773 = vmatpush3.bf16.msra.mxu0 %v1008_v39 }
 0x40a   :  { %v453_v60 = vpop.f32.mrf.mxu0 }
 0x40b   :  { %v459_v61 = vmul.f32 0.89, %v453_v60 }
 0x40c   :  { %v736_v62 = vpop.f32.mrf.mxu0 }
 0x40d   :  { %v460_v63 = vadd.f32 %v459_v61, %v1014_v42 }
 0x40e   :  { %v456_v0 = vpop.f32.mrf.mxu0 }
 0x40f   :  { %v461_v1 = vpack.c.bf16 %v460_v63, %v460_v63 }
 0x410   :  { %v737_v2 = vpop.f32.mrf.mxu0 }
 0x411   :  { %755 = vmatmul.mubr.bf16.vlgmr.msra.gmra.mxu1 %v461_v1 }
 0x4d1   :  { %v496_v3 = vpop.f32.mrf.mxu1 }
 0x4d2   :  { %v502_v4 = vmul.f32 0.89, %v496_v3 }
 0x4d3   :  { %v756_v5 = vpop.f32.mrf.mxu1 }
 0x4d4   :  { %v503_v6 = vadd.f32 %v502_v4, %v1014_v42 }
 0x4d5   :  { %v499_v7 = vpop.f32.mrf.mxu1 }
 0x4d6   :  { %v504_v8 = vpack.c.bf16 %v503_v6, %v503_v6 }
 0x4d7   :  { %v757_v9 = vpop.f32.mrf.mxu1 }
 0x4d8   :  { %775 = vmatmul.mubr.bf16.vlgmr.msra.gmra.mxu0 %v504_v8 }
 0x598   :  { %v539_v10 = vpop.f32.mrf.mxu0 }
 0x599   :  { %v545_v11 = vmul.f32 0.89, %v539_v10 }
 0x59a   :  { %v776_v12 = vpop.f32.mrf.mxu0 }
 0x59b   :  { %v546_v13 = vadd.f32 %v545_v11, %v1014_v42 }
 0x59c   :  { %v542_v14 = vpop.f32.mrf.mxu0 }
 0x59d   :  { %v547_v15 = vrot.slane %v546_v13, 4 }
 0x59e   :  { %v777_v16 = vpop.f32.mrf.mxu0 }
 0x59f   :  { %v548_v17 = vmax.f32 %v546_v13, %v547_v15 }
 0x5a1   :  { %v549_v18 = vrot.slane %v548_v17, 2 }
 0x5a3   :  { %v550_v19 = vmax.f32 %v548_v17, %v549_v18 }
 0x5a5   :  { %v551_v20 = vrot.slane %v550_v19, 1 }
 0x5a7   :  { %v552_v21 = vmax.f32 %v550_v19, %v551_v20 }
 0x5a9   :  { %v553_v22 = vsub.f32 %v546_v13, %v552_v21 }
 0x5ab   :  { %v554_v23 = vmul.f32 1.442695, %v553_v22 }
 0x5ad   :  { %798 = vpow2.f32 %v554_v23 }
 0x5ba   :  { %v799_v24 = vpop.eup %798 }
 0x5bb   :  { %v556_v25 = vrot.slane %v799_v24, 4 }
 0x5bd   :  { %v557_v26 = vadd.f32 %v799_v24, %v556_v25 }
 0x5bf   :  { %v558_v27 = vrot.slane %v557_v26, 2 }
 0x5c1   :  { %v559_v28 = vadd.f32 %v558_v27, %v557_v26 }
 0x5c3   :  { %v560_v29 = vrot.slane %v559_v28, 1 }
 0x5c5   :  { %v561_v30 = vadd.f32 %v560_v29, %v559_v28 }
 0x5c7   :  { %800 = vlog2.f32 %v561_v30 }
 0x5d4   :  { %v801_v31 = vpop.eup %800 }
 0x5d5   :  { %v563_v32 = vmul.f32 0.6931472, %v801_v31 }
 0x5d7   :  { %v564_v33 = vsub.f32 %v553_v22, %v563_v32 }
 0x5d9   :  { %565 = vst [vmem:[#allocation7] sm:$0xff] %v564_v33 }
 0x5da   :  { %853 = shalt.err (!%p850_p0)
}
 0x5db   :  { %575 = dma.vmem_to_hbm [thread:$0]  %s573_s26, 128, %s1084_s6, [#allocation4]  }
 0x5dc   :  { %866 = dma.done.wait [#allocation4], 128  }
 0x5dd   :  { %867 = vsyncadd [#allocation4], 4294967168 }
 0x5de   :  { %579 = vsyncpa [#allocation3], 1 }
 0x5df   :  { %580 = vsyncpa [#allocation6], 1 }
 0x5e0   :  { %581 = vsyncpa [#allocation4], 1 }

</bundles_post_ra>
